<compile_context>
chip_gen: v6e
topology: v6e:2x2x1
jax: 0.10.0
libtpu: 0.0.40
codegen_flags: <defaults>
</compile_context>

<pallas_src>
import math

import jax
import jax.numpy as jnp
from jax.experimental import pallas as pl
from jax.experimental.pallas import tpu as pltpu


def _block_kernel(x_ref, wf_ref, bf_ref, w2_ref, b2_ref, o_ref):
    """One block of the batch.

    x_ref  : (TB, T, C)  activations (only timestep 0 feeds the result)
    wf_ref : (C, H)      fused  Wv @ W1          (H = 4 * out_dims)
    bf_ref : (1, H)      fused  bv @ W1 + b1
    w2_ref : (H, O)
    b2_ref : (1, O)
    o_ref  : (TB, O)
    """
    x0 = x_ref[:, 0, :]                                                    # (TB, C)
    h1 = jnp.maximum(
        jnp.dot(x0, wf_ref[...], preferred_element_type=jnp.float32)
        + bf_ref[...],
        0.0)                                                               # (TB, H)
    o_ref[...] = (jnp.dot(h1, w2_ref[...], preferred_element_type=jnp.float32)
                  + b2_ref[...]).astype(o_ref.dtype)                       # (TB, O)


def prepare_block_params(params):
    """One-time param prep (amortized across forward calls).

    Folds the (mathematically dead) attention down to a fused first MLP layer:
        W_fused = Wv @ W1,   b_fused = bv @ W1 + b1.
    Wk/Wq/bk/bq never influence the output under the module's literal
    is_causal semantics with L=1 (see header note).
    """
    (wk, bk, wq, bq, wv, bv, w1, b1, w2, b2) = params
    del wk, bk, wq, bq
    w_fused = (wv @ w1).astype(jnp.float32)          # (C, H)
    b_fused = (bv @ w1 + b1).astype(jnp.float32)     # (1, H)
    return (w_fused, b_fused, w2.astype(jnp.float32), b2.astype(jnp.float32))


def block_forward(x, prepared_params, *, batch_tile=512):
    """x: (B, T, C) float32.  Returns (B, 1, out_dims) float32."""
    w_fused, b_fused, w2, b2 = prepared_params
    B, T, C = x.shape
    H = w_fused.shape[1]
    O = w2.shape[1]

    flops = 2 * B * (C * H + H * O)
    bytes_accessed = 4 * (B * T * C + C * H + H + H * O + O + B * O)
    cost = pl.CostEstimate(flops=flops, transcendentals=0,
                           bytes_accessed=bytes_accessed)

    if B <= batch_tile:
        # Small batch: gridless call, everything whole-array resident in VMEM.
        # No pipeline prologue/epilogue, no operand double-buffering.
        out = pl.pallas_call(
            _block_kernel,
            out_shape=jax.ShapeDtypeStruct((B, O), jnp.float32),
            in_specs=[pl.BlockSpec(memory_space=pltpu.MemorySpace.VMEM)] * 5,
            out_specs=pl.BlockSpec(memory_space=pltpu.MemorySpace.VMEM),
            cost_estimate=cost,
        )(x, w_fused, b_fused, w2, b2)
    else:
        # Large batch: tile the batch, keep weights VMEM-resident across steps,
        # mark the batch axis "parallel" (megacore sharding on v7x).
        tb = batch_tile  # multiple of 8 (sublane); activations per step stay tiny.
        grid = (pl.cdiv(B, tb),)
        out = pl.pallas_call(
            _block_kernel,
            out_shape=jax.ShapeDtypeStruct((B, O), jnp.float32),
            grid=grid,
            in_specs=[
                pl.BlockSpec((tb, T, C), lambda i: (i, 0, 0)),   # activations stream
                pl.BlockSpec((C, H), lambda i: (0, 0)),          # weights resident
                pl.BlockSpec((1, H), lambda i: (0, 0)),
                pl.BlockSpec((H, O), lambda i: (0, 0)),
                pl.BlockSpec((1, O), lambda i: (0, 0)),
            ],
            out_specs=pl.BlockSpec((tb, O), lambda i: (i, 0)),
            cost_estimate=cost,
            compiler_params=pltpu.CompilerParams(
                dimension_semantics=("parallel",)),
        )(x, w_fused, b_fused, w2, b2)

    return out.reshape(B, 1, O)


def block_reference(x, params, n_head):
    """Pure-JAX reference mirroring the PyTorch forward exactly (eval mode),
    including the full (un-simplified) attention math."""
    (wk, bk, wq, bq, wv, bv, w1, b1, w2, b2) = params
    B, T, C = x.shape
    A = wk.shape[1]
    hd = A // n_head

    k = x @ wk + bk                        # (B, T, A)
    v = x @ wv + bv                        # (B, T, A)
    q = x[:, -1:, :] @ wq + bq             # (B, 1, A)

    k = k.reshape(B, T, n_head, hd).transpose(0, 2, 1, 3)      # (B, nh, T, hd)
    v = v.reshape(B, T, n_head, hd).transpose(0, 2, 1, 3)
    q = q.reshape(B, 1, n_head, hd).transpose(0, 2, 1, 3)      # (B, nh, 1, hd)

    s = jnp.einsum("bhqd,bhkd->bhqk", q, k) / math.sqrt(hd)    # (B, nh, 1, T)
    mask = (jnp.arange(T)[None, :] <= jnp.arange(1)[:, None])  # top-left causal (1, T)
    s = jnp.where(mask[None, None], s, -jnp.inf)
    p = jax.nn.softmax(s, axis=-1)
    y = jnp.einsum("bhqk,bhkd->bhqd", p, v)                    # (B, nh, 1, hd)
    y = y.transpose(0, 2, 1, 3).reshape(B, 1, A)

    h1 = jnp.maximum(y @ w1 + b1, 0.0)
    return h1 @ w2 + b2                                        # dropout = identity (eval)


if __name__ == "__main__":
    T = 8
    in_dims, att_dims, out_dims, n_heads = 32, 32, 32, 4

    key = jax.random.PRNGKey(0)
    ks = jax.random.split(key, 12)

    def init(k, shape):
        return 0.1 * jax.random.normal(k, shape, jnp.float32)

    # Linear weights stored already transposed: (in, out); biases as (1, out).
    wk = init(ks[1], (in_dims, att_dims));  bk = init(ks[2], (1, att_dims))
    wq = init(ks[3], (in_dims, att_dims));  bq = init(ks[4], (1, att_dims))
    wv = init(ks[5], (in_dims, att_dims));  bv = init(ks[6], (1, att_dims))
    w1 = init(ks[7], (att_dims, 4 * out_dims)); b1 = init(ks[8], (1, 4 * out_dims))
    w2 = init(ks[9], (4 * out_dims, out_dims)); b2 = init(ks[10], (1, out_dims))

    params = (wk, bk, wq, bq, wv, bv, w1, b1, w2, b2)
    prepared = prepare_block_params(params)

    # --- small batch: gridless VMEM-resident path -----------------------------
    B = 2
    x = jax.random.normal(ks[0], (B, T, in_dims), jnp.float32)
    out = jax.block_until_ready(block_forward(x, prepared))
    ref = block_reference(x, params, n_heads)
    assert out.shape == (B, 1, out_dims), out.shape
    assert jnp.allclose(out, ref, atol=1e-4, rtol=1e-4), (
        f"small-B max abs err = {jnp.max(jnp.abs(out - ref))}")

    # --- larger batch: B-tiled, weight-resident, parallel-axis path -----------
    B_large = 1024
    x_large = jax.random.normal(ks[11], (B_large, T, in_dims), jnp.float32)
    out_large = jax.block_until_ready(block_forward(x_large, prepared, batch_tile=512))
    ref_large = block_reference(x_large, params, n_heads)
    assert out_large.shape == (B_large, 1, out_dims), out_large.shape
    assert jnp.allclose(out_large, ref_large, atol=1e-4, rtol=1e-4), (
        f"large-B max abs err = {jnp.max(jnp.abs(out_large - ref_large))}")

    print("KERNEL_OK")
</pallas_src>

<mosaic_0001>
module attributes {stable_mosaic.version = 11 : i64} {
  func.func @_block_kernel(%arg0: memref<2x8x32xf32, #tpu.memory_space<vmem>>, %arg1: memref<32x128xf32, #tpu.memory_space<vmem>>, %arg2: memref<1x128xf32, #tpu.memory_space<vmem>>, %arg3: memref<128x32xf32, #tpu.memory_space<vmem>>, %arg4: memref<1x32xf32, #tpu.memory_space<vmem>>, %arg5: memref<2x32xf32, #tpu.memory_space<vmem>>) attributes {dimension_semantics = [], scalar_prefetch = 0 : i64, scratch_operands = 0 : i64, tpu.core_type = #tpu.core_type<tc>} {
    %c0 = arith.constant 0 : index
    %c0_0 = arith.constant 0 : index
    %c0_1 = arith.constant 0 : index
    %0 = vector.load %arg0[%c0, %c0_0, %c0_1] : memref<2x8x32xf32, #tpu.memory_space<vmem>>, vector<2x1x32xf32>
    %1 = vector.shape_cast %0 : vector<2x1x32xf32> to vector<2x32xf32>
    %c0_2 = arith.constant 0 : index
    %c0_3 = arith.constant 0 : index
    %2 = vector.load %arg1[%c0_2, %c0_3] : memref<32x128xf32, #tpu.memory_space<vmem>>, vector<32x128xf32>
    %cst = arith.constant dense<0.000000e+00> : vector<2x128xf32>
    %3 = tpu.matmul %1, %2, %cst {dimension_numbers = #tpu.dot_dimension_numbers<[1], [0], [0], [1], [0, 0, 1, 1], [], []>} : vector<2x32xf32>, vector<32x128xf32>, vector<2x128xf32> -> vector<2x128xf32>
    %c0_4 = arith.constant 0 : index
    %c0_5 = arith.constant 0 : index
    %4 = vector.load %arg2[%c0_4, %c0_5] : memref<1x128xf32, #tpu.memory_space<vmem>>, vector<1x128xf32>
    %5 = vector.broadcast %4 : vector<1x128xf32> to vector<2x128xf32>
    %6 = arith.addf %3, %5 : vector<2x128xf32>
    %cst_6 = arith.constant 0.000000e+00 : f32
    %7 = vector.broadcast %cst_6 : f32 to vector<2x128xf32>
    %8 = arith.maximumf %6, %7 : vector<2x128xf32>
    %c0_7 = arith.constant 0 : index
    %c0_8 = arith.constant 0 : index
    %9 = vector.load %arg3[%c0_7, %c0_8] : memref<128x32xf32, #tpu.memory_space<vmem>>, vector<128x32xf32>
    %cst_9 = arith.constant dense<0.000000e+00> : vector<2x32xf32>
    %10 = tpu.matmul %8, %9, %cst_9 {dimension_numbers = #tpu.dot_dimension_numbers<[1], [0], [0], [1], [0, 0, 1, 1], [], []>} : vector<2x128xf32>, vector<128x32xf32>, vector<2x32xf32> -> vector<2x32xf32>
    %c0_10 = arith.constant 0 : index
    %c0_11 = arith.constant 0 : index
    %11 = vector.load %arg4[%c0_10, %c0_11] : memref<1x32xf32, #tpu.memory_space<vmem>>, vector<1x32xf32>
    %12 = vector.broadcast %11 : vector<1x32xf32> to vector<2x32xf32>
    %13 = arith.addf %10, %12 : vector<2x32xf32>
    %c0_12 = arith.constant 0 : index
    %c0_13 = arith.constant 0 : index
    %14 = vector.load %arg5[%c0_12, %c0_13] : memref<2x32xf32, #tpu.memory_space<vmem>>, vector<2x32xf32>
    tpu.vector_store %arg5[%c0_12, %c0_13], %13 {strides = array<i32>} : memref<2x32xf32, #tpu.memory_space<vmem>>, vector<2x32xf32>,
    return
  }
}

</mosaic_0001>

<bundles_post_ra>
// kernel: tpu_custom_call.1
= control target key start
LH: loop header
LB: loop body
LE: loop exit
PB: predicated region body
PF: predicated region fallthrough
CT: control target
= control target key end

     0   :  { %v318_v1 = vmov 0.0   ;;  %vm319_vm0 = vmmov 0   ;;  %vm37_vm1 = vcmask 1041409   ;;  %vm39_vm2 = vcmask 261120   ;;  %s450_s0 = inlined_call_operand.vmem [shape: f32[2,8,32], index: 0, kind: input, shape index: {}]   ;;  %s451_s1 = inlined_call_operand.vmem [shape: f32[32,128], index: 1, kind: input, shape index: {}]   ;;  %s452_s2 = inlined_call_operand.vmem [shape: f32[1,128], index: 2, kind: input, shape index: {}]   ;;  %s453_s3 = inlined_call_operand.vmem [shape: f32[128,32], index: 3, kind: input, shape index: {}]   ;;  %s454_s4 = inlined_call_operand.vmem [shape: f32[1,32], index: 4, kind: input, shape index: {}]   ;;  %s455_s5 = inlined_call_operand.hbm [shape: f32[2,32], index: 5, kind: output, shape index: {}]  }
   0x1   :  { %v26_v0 = vld [vmem:[%s451_s1 + $0x18] sm:$0xff]  ;;  %247 = vmatprep.subr.mxu0 %v318_v1  ;;  %v25_v2 = vld [vmem:[%s451_s1 + $0x10] sm:$0xff]  ;;  %255 = vmatprep.mubr.msk.f32.mxu0 %vm319_vm0, %v318_v1  ;;  %v22_v3 = vld [vmem:[%s450_s0 + $0x8] sm:$0x1] }
   0x2   :  { %248 = vmatpush3.msra.mxu0 %v26_v0  ;;  %v36_v4 = vrot.slane %v22_v3, 7  ;;  %258 = vmatprep.subr.mxu1 %v318_v1  ;;  %v128_v5 = vld [vmem:[%s453_s3 + $0x78] sm:$0xff]  ;;  %v127_v6 = vld [vmem:[%s453_s3 + $0x70] sm:$0xff]  ;;  %v24_v7 = vld [vmem:[%s451_s1 + $0x8] sm:$0xff] }
   0x3   :  { %249 = vmatprep.subr.mxu0 %v318_v1  ;;  %v21_v8 = vld [vmem:[%s450_s0] sm:$0x1]  ;;  %259 = vmatpush3.msra.mxu1 %v128_v5  ;;  %v126_v9 = vld [vmem:[%s453_s3 + $0x68] sm:$0xff] }
   0x4   :  { %250 = vmatpush3.msra.mxu0 %v25_v2  ;;  %260 = vmatprep.subr.mxu1 %v318_v1  ;;  %v23_v10 = vld [vmem:[%s451_s1] sm:$0xff]  ;;  %v38_v11 = vsel %vm37_vm1, %v36_v4, %v21_v8 }
   0x5   :  { %251 = vmatprep.subr.mxu0 %v318_v1  ;;  %261 = vmatpush3.msra.mxu1 %v127_v6  ;;  %v125_v12 = vld [vmem:[%s453_s3 + $0x60] sm:$0xff] }
   0x6   :  { %252 = vmatpush3.msra.mxu0 %v24_v7  ;;  %262 = vmatprep.subr.mxu1 %v318_v1 }
   0x7   :  { %10 = vsyncpa [#allocation3], 0  ;;  %253 = vmatprep.subr.mxu0 %v318_v1  ;;  %263 = vmatpush3.msra.mxu1 %v126_v9  ;;  %v124_v13 = vld [vmem:[%s453_s3 + $0x58] sm:$0xff]  ;;  %v123_v14 = vld [vmem:[%s453_s3 + $0x50] sm:$0xff]  ;;  %s320_s13 = smov [#allocation2]   ;;  %vm206_vm3 = vcmask 254976  }
   0x8   :  { %254 = vmatpush3.msra.mxu0 %v23_v10  ;;  %264 = vmatprep.subr.mxu1 %v318_v1  ;;  %v122_v15 = vld [vmem:[%s453_s3 + $0x48] sm:$0xff]  ;;  %v121_v16 = vld [vmem:[%s453_s3 + $0x40] sm:$0xff]  ;;  %v120_v17 = vld [vmem:[%s453_s3 + $0x38] sm:$0xff]  ;;  %s214_s1 = sshll.u32 %s320_s13, 4  ;;  %s215_s1 = int_to_ptr.vmem [resolvable:$true] %s214_s1 }
   0x9   :  { %256 = vmatmul.mubr.msk.f32.vlgmr.msra.gmra.mxu0 %vm39_vm2, %v38_v11  ;;  %265 = vmatpush3.msra.mxu1 %v125_v12  ;;  %v119_v18 = vld [vmem:[%s453_s3 + $0x30] sm:$0xff]  ;;  %v118_v19 = vld [vmem:[%s453_s3 + $0x28] sm:$0xff]  ;;  %v117_v20 = vld [vmem:[%s453_s3 + $0x20] sm:$0xff]  ;;  %p301_p1 = scmp.lt.s32.totalorder %s215_s1, %s215_s1 }
   0xa   :  { %266 = vmatprep.subr.mxu1 %v318_v1  ;;  %290 = vmatprep.mubr.msk.f32.mxu1 %vm319_vm0, %v318_v1  ;;  %v116_v21 = vld [vmem:[%s453_s3 + $0x18] sm:$0xff]  ;;  %v115_v22 = vld [vmem:[%s453_s3 + $0x10] sm:$0xff]  ;;  %v114_v23 = vld [vmem:[%s453_s3 + $0x8] sm:$0xff] }
   0xb   :  { %267 = vmatpush3.msra.mxu1 %v124_v13  ;;  %v113_v24 = vld [vmem:[%s453_s3] sm:$0xff]  ;;  %s296_s3 = scalar_lea.vmem %s215_s1, 32 }
   0xc   :  { %268 = vmatprep.subr.mxu1 %v318_v1  ;;  %v222_v25 = vld [vmem:[%s452_s2] ss:$0 sm:$0xff]  ;;  %p297_p0 = scmp.ne.s32.totalorder %s215_s1, %s296_s3  ;;  %p302_p2 = scmp.lt.s32.totalorder %s296_s3, %s296_s3 }
   0xd   :  { %269 = vmatpush3.msra.mxu1 %v123_v14  ;;  %v224_v30 = vld [vmem:[%s454_s4] ss:$0 sm:$0xff] }
   0xe   :  { %270 = vmatprep.subr.mxu1 %v318_v1  ;;  %p303_p3 = por %p302_p2, %p301_p1 }
   0xf   :  { %271 = vmatpush3.msra.mxu1 %v122_v15 }
  0x10   :  { %272 = vmatprep.subr.mxu1 %v318_v1  ;;  %p304_p4 = pnand %p303_p3, %p297_p0 }
  0x11   :  { %273 = vmatpush3.msra.mxu1 %v121_v16 }
  0x12   :  { %274 = vmatprep.subr.mxu1 %v318_v1 }
  0x13   :  { %275 = vmatpush3.msra.mxu1 %v120_v17 }
  0x14   :  { %276 = vmatprep.subr.mxu1 %v318_v1 }
  0x15   :  { %277 = vmatpush3.msra.mxu1 %v119_v18 }
  0x16   :  { %278 = vmatprep.subr.mxu1 %v318_v1 }
  0x17   :  { %279 = vmatpush3.msra.mxu1 %v118_v19 }
  0x18   :  { %280 = vmatprep.subr.mxu1 %v318_v1 }
  0x19   :  { %281 = vmatpush3.msra.mxu1 %v117_v20 }
  0x1a   :  { %282 = vmatprep.subr.mxu1 %v318_v1 }
  0x1b   :  { %283 = vmatpush3.msra.mxu1 %v116_v21 }
  0x1c   :  { %284 = vmatprep.subr.mxu1 %v318_v1 }
  0x1d   :  { %285 = vmatpush3.msra.mxu1 %v115_v22 }
  0x1e   :  { %286 = vmatprep.subr.mxu1 %v318_v1 }
  0x1f   :  { %287 = vmatpush3.msra.mxu1 %v114_v23 }
  0x20   :  { %288 = vmatprep.subr.mxu1 %v318_v1 }
  0x21   :  { %289 = vmatpush3.msra.mxu1 %v113_v24 }
  0xc9   :  { %v108_v26 = vpop.f32.mrf.mxu0 }
  0xca   :  { %v109_v27 = vadd.f32 %v222_v25, %v108_v26 }
  0xcb   :  { %v257_v28 = vpop.f32.mrf.mxu0 }
  0xcc   :  { %v112_v29 = vmax.f32 %v109_v27, 0.0 }
  0xce   :  { %291 = vmatmul.mubr.f32.vlgmr.msra.gmra.mxu1 %v112_v29 }
 0x18e   :  { %v202_v31 = vpop.f32.mrf.mxu1 }
 0x18f   :  { %v203_v32 = vadd.f32 %v224_v30, %v202_v31 }
 0x190   :  { %v292_v33 = vpop.f32.mrf.mxu1 }
 0x191   :  { %207 = vst.msk [vmem:[#allocation2] sm:$0x3] %vm206_vm3, %v203_v32 }
 0x192   :  { %307 = shalt.err (!%p304_p4)
}
 0x193   :  { %217 = dma.vmem_to_hbm [thread:$0]  %s215_s1, 32, %s455_s5, [#allocation3]  }
 0x194   :  { %316 = dma.done.wait [#allocation3], 32  }
 0x195   :  { %317 = vsyncadd [#allocation3], 4294967264 }
 0x196   :  { %221 = vsyncpa [#allocation3], 1 }

</bundles_post_ra>
